<compile_context>
chip_gen: v5e
topology: v5e:2x2
jax: 0.10.0
libtpu: 0.0.40
codegen_flags: <defaults>
</compile_context>

<pallas_src>
import jax
import jax.numpy as jnp
from jax.experimental import pallas as pl
from jax.experimental.pallas import tpu as pltpu

DROP_P = 0.2
SCALE = 1.5


def _attn_dropout_kernel(x1_ref, x2_ref, u_ref, o_ref):
    # x1_ref: (T, M, K)   x2_ref: (T, N, K)   u_ref: (T, M, N)   o_ref: (T, M, K)
    q = x1_ref[...].astype(jnp.bfloat16)
    k = x2_ref[...].astype(jnp.bfloat16)

    # v1 = x1 @ x2^T ; v2 = v1 / 1.5  (contract on the shared last dim -> no transpose,
    # batched einsum drives the MXU with bf16 operands / f32 accumulation)
    s = jnp.einsum("bmk,bnk->bmn", q, k, preferred_element_type=jnp.float32)
    s = s * (1.0 / SCALE)

    # v3 = softmax over the last dim.  The 1/l normalization is folded into the
    # per-row scale applied AFTER the second matmul (mathematically identical,
    # removes an (M,N)-sized multiply from the VPU).
    m = jnp.max(s, axis=-1, keepdims=True)
    e = jnp.exp(s - m)                      # unnormalized probs in (0, 1]
    l = jnp.sum(e, axis=-1, keepdims=True)  # softmax denominator per row

    # v4 = dropout(p=0.2): keep w.p. 0.8 -- a single compare against precomputed
    # uniforms, no in-kernel bit fiddling / dtype conversion chain.
    keep = u_ref[...] >= DROP_P
    e = jnp.where(keep, e, 0.0)

    # v5 = v4 @ x2, with the softmax 1/l and dropout 1/(1-p) folded into one tiny
    # (T, M, 1) row scale applied to the accumulator.
    acc = jnp.einsum("bmn,bnk->bmk", e.astype(jnp.bfloat16), k,
                     preferred_element_type=jnp.float32)
    inv = 1.0 / (l * (1.0 - DROP_P))
    o_ref[...] = (acc * inv).astype(o_ref.dtype)


def _pick_tile_bh(bh, m, n, k, vmem_budget_bytes=8 * 1024 * 1024):
    """Largest divisor of BH whose double-buffered working set fits a conservative
    VMEM budget (safe on v5e/v6e 128 MiB and v7x 64 MiB physical / 32 MiB scoped)."""
    best = 1
    for t in range(1, bh + 1):
        if bh % t:
            continue
        io_bytes = 2 * t * (m * k + n * k + m * n + m * k) * 4   # 2x for double buffering
        tmp_bytes = 4 * t * m * n * 4                            # s / e / keep intermediates
        if io_bytes + tmp_bytes <= vmem_budget_bytes:
            best = t
    return best


@jax.jit
def model_forward(x1, x2, key):
    B, H, M, K = x1.shape
    _, _, N, K2 = x2.shape
    assert K == K2
    BH = B * H
    x1f = x1.reshape(BH, M, K)
    x2f = x2.reshape(BH, N, K)

    # TODO(synk): switch to in-kernel pltpu.prng_random_bits (seeded once) when the
    # interpret-mode lowering exists; for now the mask uniforms stream from HBM.
    u = jax.random.uniform(key, (BH, M, N), dtype=jnp.float32)

    tile_bh = _pick_tile_bh(BH, M, N, K)
    grid = (BH // tile_bh,)

    flops = 2 * 2 * BH * M * N * K                                  # two matmuls
    bytes_accessed = 4 * (2 * BH * M * K + BH * N * K + BH * M * N)  # x1 + out + x2 + mask

    out = pl.pallas_call(
        _attn_dropout_kernel,
        out_shape=jax.ShapeDtypeStruct((BH, M, K), jnp.float32),
        grid_spec=pltpu.PrefetchScalarGridSpec(
            num_scalar_prefetch=0,
            grid=grid,
            in_specs=[
                pl.BlockSpec((tile_bh, M, K), lambda i: (i, 0, 0)),
                pl.BlockSpec((tile_bh, N, K), lambda i: (i, 0, 0)),
                pl.BlockSpec((tile_bh, M, N), lambda i: (i, 0, 0)),
            ],
            out_specs=pl.BlockSpec((tile_bh, M, K), lambda i: (i, 0, 0)),
        ),
        compiler_params=pltpu.CompilerParams(
            dimension_semantics=("parallel",),   # independent (b,h) tiles -> megacore on v7x
        ),
        cost_estimate=pl.CostEstimate(
            flops=flops, transcendentals=BH * M * N, bytes_accessed=bytes_accessed
        ),
    )(x1f, x2f, u)
    return out.reshape(B, H, M, K)


def _reference(x1, x2, key):
    """Pure-JAX reference with the same dropout mask (f32 throughout)."""
    B, H, M, K = x1.shape
    N = x2.shape[2]
    u = jax.random.uniform(key, (B * H, M, N), dtype=jnp.float32).reshape(B, H, M, N)
    s = jnp.einsum("bhmk,bhnk->bhmn", x1, x2) / SCALE
    p = jax.nn.softmax(s, axis=-1)
    p = jnp.where(u >= DROP_P, p / (1.0 - DROP_P), 0.0)
    return jnp.einsum("bhmn,bhnk->bhmk", p, x2)


if __name__ == "__main__":
    key = jax.random.PRNGKey(0)
    k1, k2, kd = jax.random.split(key, 3)
    # Small shapes consistent with the forward: x1 (B,H,M,K), x2 (B,H,N,K)
    B, H, M, N, K = 2, 2, 8, 16, 32
    x1 = jax.random.normal(k1, (B, H, M, K), dtype=jnp.float32)   # torch.randn analogue
    x2 = jax.random.uniform(k2, (B, H, N, K), dtype=jnp.float32)  # torch.rand analogue

    out = model_forward(x1, x2, kd)
    jax.block_until_ready(out)
    assert out.shape == (B, H, M, K)

    ref = _reference(x1, x2, kd)
    # Loose tolerance accounts for bf16 MXU operands (f32 accumulation).
    assert jnp.allclose(out, ref, rtol=1e-1, atol=5e-2), "mismatch vs f32 reference"
    print("KERNEL_OK")
</pallas_src>

<mosaic_0001>
module attributes {stable_mosaic.version = 11 : i64} {
  func.func @_attn_dropout_kernel(%arg0: i32, %arg1: memref<4x8x32xf32, #tpu.memory_space<vmem>>, %arg2: memref<4x16x32xf32, #tpu.memory_space<vmem>>, %arg3: memref<4x8x16xf32, #tpu.memory_space<vmem>>, %arg4: memref<4x8x32xf32, #tpu.memory_space<vmem>>) attributes {dimension_semantics = [#tpu.dimension_semantics<parallel>], iteration_bounds = array<i64: 1>, scalar_prefetch = 0 : i64, scratch_operands = 0 : i64, tpu.core_type = #tpu.core_type<tc>, window_params = [{transform_indices = @transform_0, window_bounds = array<i64: 4, 8, 32>}, {transform_indices = @transform_1, window_bounds = array<i64: 4, 16, 32>}, {transform_indices = @transform_2, window_bounds = array<i64: 4, 8, 16>}, {transform_indices = @transform_3, window_bounds = array<i64: 4, 8, 32>}]} {
    %c0 = arith.constant 0 : index
    %c0_0 = arith.constant 0 : index
    %c0_1 = arith.constant 0 : index
    %0 = vector.load %arg1[%c0, %c0_0, %c0_1] : memref<4x8x32xf32, #tpu.memory_space<vmem>>, vector<4x8x32xf32>
    %1 = arith.truncf %0 : vector<4x8x32xf32> to vector<4x8x32xbf16>
    %c0_2 = arith.constant 0 : index
    %c0_3 = arith.constant 0 : index
    %c0_4 = arith.constant 0 : index
    %2 = vector.load %arg2[%c0_2, %c0_3, %c0_4] : memref<4x16x32xf32, #tpu.memory_space<vmem>>, vector<4x16x32xf32>
    %3 = arith.truncf %2 : vector<4x16x32xf32> to vector<4x16x32xbf16>
    "tpu.trace_start"() <{level = 10 : i32, message = "bmk,bnk->bmn"}> : () -> ()
    %cst = arith.constant dense<0.000000e+00> : vector<4x8x16xf32>
    %4 = tpu.matmul %1, %3, %cst {dimension_numbers = #tpu.dot_dimension_numbers<[2], [2], [1], [1], [0, 0, 0, 1, 1, 1], [0], [0]>} : vector<4x8x32xbf16>, vector<4x16x32xbf16>, vector<4x8x16xf32> -> vector<4x8x16xf32>
    "tpu.trace_stop"() : () -> ()
    %cst_5 = arith.constant 0.666666686 : f32
    %5 = vector.broadcast %cst_5 : f32 to vector<4x8x16xf32>
    %6 = arith.mulf %4, %5 : vector<4x8x16xf32>
    %cst_6 = arith.constant dense<0xFF800000> : vector<4x8xf32>
    %7 = vector.multi_reduction <maximumf>, %6, %cst_6 [2] : vector<4x8x16xf32> to vector<4x8xf32>
    %8 = vector.shape_cast %7 : vector<4x8xf32> to vector<4x8x1xf32>
    %9 = vector.broadcast %8 : vector<4x8x1xf32> to vector<4x8x16xf32>
    %10 = arith.subf %6, %9 : vector<4x8x16xf32>
    %11 = math.exp %10 : vector<4x8x16xf32>
    %cst_7 = arith.constant dense<0.000000e+00> : vector<4x8xf32>
    %12 = vector.multi_reduction <add>, %11, %cst_7 [2] : vector<4x8x16xf32> to vector<4x8xf32>
    %13 = vector.shape_cast %12 : vector<4x8xf32> to vector<4x8x1xf32>
    %c0_8 = arith.constant 0 : index
    %c0_9 = arith.constant 0 : index
    %c0_10 = arith.constant 0 : index
    %14 = vector.load %arg3[%c0_8, %c0_9, %c0_10] : memref<4x8x16xf32, #tpu.memory_space<vmem>>, vector<4x8x16xf32>
    %cst_11 = arith.constant 2.000000e-01 : f32
    %15 = vector.broadcast %cst_11 : f32 to vector<4x8x16xf32>
    %16 = arith.cmpf oge, %14, %15 : vector<4x8x16xf32>
    %cst_12 = arith.constant 0.000000e+00 : f32
    %17 = vector.broadcast %cst_12 : f32 to vector<4x8x16xf32>
    %18 = arith.select %16, %11, %17 : vector<4x8x16xi1>, vector<4x8x16xf32>
    %19 = arith.truncf %18 : vector<4x8x16xf32> to vector<4x8x16xbf16>
    "tpu.trace_start"() <{level = 10 : i32, message = "bmn,bnk->bmk"}> : () -> ()
    %cst_13 = arith.constant dense<0.000000e+00> : vector<4x8x32xf32>
    %20 = tpu.matmul %19, %3, %cst_13 {dimension_numbers = #tpu.dot_dimension_numbers<[2], [1], [1], [2], [0, 0, 0, 1, 1, 2], [0], [0]>} : vector<4x8x16xbf16>, vector<4x16x32xbf16>, vector<4x8x32xf32> -> vector<4x8x32xf32>
    "tpu.trace_stop"() : () -> ()
    %cst_14 = arith.constant 8.000000e-01 : f32
    %21 = vector.broadcast %cst_14 : f32 to vector<4x8x1xf32>
    %22 = arith.mulf %13, %21 : vector<4x8x1xf32>
    %cst_15 = arith.constant 1.000000e+00 : f32
    %23 = vector.broadcast %cst_15 : f32 to vector<4x8x1xf32>
    %24 = arith.divf %23, %22 : vector<4x8x1xf32>
    %25 = vector.broadcast %24 : vector<4x8x1xf32> to vector<4x8x32xf32>
    %26 = arith.mulf %20, %25 : vector<4x8x32xf32>
    %c0_16 = arith.constant 0 : index
    %c0_17 = arith.constant 0 : index
    %c0_18 = arith.constant 0 : index
    %27 = vector.load %arg4[%c0_16, %c0_17, %c0_18] : memref<4x8x32xf32, #tpu.memory_space<vmem>>, vector<4x8x32xf32>
    tpu.vector_store %arg4[%c0_16, %c0_17, %c0_18], %26 {strides = array<i32>} : memref<4x8x32xf32, #tpu.memory_space<vmem>>, vector<4x8x32xf32>,
    return
  }
  func.func @transform_0(%arg0: i32) -> (i32, i32, i32) {
    %c0_i32 = arith.constant 0 : i32
    %c0_i32_0 = arith.constant 0 : i32
    %c0_i32_1 = arith.constant 0 : i32
    return %arg0, %c0_i32, %c0_i32_0 : i32, i32, i32
  }
  func.func @transform_1(%arg0: i32) -> (i32, i32, i32) {
    %c0_i32 = arith.constant 0 : i32
    %c0_i32_0 = arith.constant 0 : i32
    %c0_i32_1 = arith.constant 0 : i32
    return %arg0, %c0_i32, %c0_i32_0 : i32, i32, i32
  }
  func.func @transform_2(%arg0: i32) -> (i32, i32, i32) {
    %c0_i32 = arith.constant 0 : i32
    %c0_i32_0 = arith.constant 0 : i32
    %c0_i32_1 = arith.constant 0 : i32
    return %arg0, %c0_i32, %c0_i32_0 : i32, i32, i32
  }
  func.func @transform_3(%arg0: i32) -> (i32, i32, i32) {
    %c0_i32 = arith.constant 0 : i32
    %c0_i32_0 = arith.constant 0 : i32
    %c0_i32_1 = arith.constant 0 : i32
    return %arg0, %c0_i32, %c0_i32_0 : i32, i32, i32
  }
}

</mosaic_0001>

<bundles_post_ra>
// kernel: model_forward.1
= control target key start
LH: loop header
LB: loop body
LE: loop exit
PB: predicated region body
PF: predicated region fallthrough
CT: control target
= control target key end

     0   :  { %8 = vsyncpa [#allocation3], 0  ;;  %s533_s0 = inlined_call_operand.vmem [shape: f32[4,8,32], index: 0, kind: input, shape index: {}]   ;;  %s534_s1 = inlined_call_operand.hbm [shape: f32[4,16,32], index: 1, kind: input, shape index: {}]   ;;  %s535_s2 = inlined_call_operand.vmem [shape: f32[4,8,16], index: 2, kind: input, shape index: {}]   ;;  %s536_s3 = inlined_call_operand.hbm [shape: f32[4,8,32], index: 3, kind: output, shape index: {}]  }
   0x1   :  { %9 = vsyncpa [#allocation4], 0  ;;  %s16_s14 = sshll.u32 %s534_s1, 4  ;;  %s449_s15 = smov [#allocation2]   ;;  %s17_s14 = int_to_ptr.hbm [resolvable:$true] %s16_s14 }
   0x2   :  { %s18_s16 = sshll.u32 %s449_s15, 4  ;;  %s450_s17 = smov 128   ;;  %s19_s16 = int_to_ptr.vmem [resolvable:$true] %s18_s16 }
   0x3   :  { %s451_s18 = smov 8  }
   0x4   :  { %24 = dma.hbm_to_vmem [thread:$0]  %s17_s14, 1024, %s19_s16, [#allocation3], %s450_s17, %s450_s17, %s451_s18  }
   0x5   :  { %445 = dma.done.wait [#allocation3], 1024  }
   0x6   :  { %446 = vsyncadd [#allocation3], 4294966272  ;;  %v40_v0 = vld [vmem:[#allocation2] sm:$0xff]  ;;  %v41_v1 = vld [vmem:[#allocation2 + $0x8] sm:$0xff]  ;;  %vm61_vm0 = vcmask 261120   ;;  %vm157_vm1 = vcmask 130048  }
   0x7   :  { %v44_v2 = vld [vmem:[#allocation2 + $0x20] sm:$0xff]  ;;  %v48_v3 = vpack.c.bf16 %v40_v0, %v40_v0  ;;  %v49_v4 = vpack.c.bf16 %v41_v1, %v41_v1  ;;  %v45_v5 = vld [vmem:[#allocation2 + $0x28] sm:$0xff]  ;;  %v46_v7 = vld [vmem:[#allocation2 + $0x30] sm:$0xff]  ;;  %s356_s9 = sshll.u32 %s536_s3, 4  ;;  %s357_s9 = int_to_ptr.hbm [resolvable:$true] %s356_s9 }
   0x8   :  { %v52_v6 = vpack.c.bf16 %v44_v2, %v44_v2  ;;  %v47_v8 = vld [vmem:[#allocation2 + $0x38] sm:$0xff]  ;;  %v53_v9 = vpack.c.bf16 %v45_v5, %v45_v5  ;;  %v54_v10 = vpack.c.bf16 %v46_v7, %v46_v7  ;;  %v42_v15 = vld [vmem:[#allocation2 + $0x10] sm:$0xff]  ;;  %v32_v30 = vld [vmem:[%s533_s0] sm:$0xff] }
   0x9   :  { %v55_v11 = vpack.c.bf16 %v47_v8, %v47_v8  ;;  %v58_v12 = vunpack.c.l.b16 %v48_v3  ;;  %v59_v13 = vunpack.c.l.b16 %v49_v4  ;;  %v43_v16 = vld [vmem:[#allocation2 + $0x18] sm:$0xff]  ;;  %v50_v21 = vpack.c.bf16 %v42_v15, %v42_v15  ;;  %v34_v31 = vld [vmem:[%s533_s0 + $0x10] sm:$0xff]  ;;  %v33_v38 = vld [vmem:[%s533_s0 + $0x8] sm:$0xff] }
   0xa   :  { %v107_v14 = vunpack.c.l.b16 %v52_v6  ;;  %v108_v17 = vunpack.c.l.b16 %v53_v9  ;;  %v131_v18 = vunpack.c.l.b16 %v54_v10  ;;  %v51_v22 = vpack.c.bf16 %v43_v16, %v43_v16  ;;  %v35_v32 = vld [vmem:[%s533_s0 + $0x18] sm:$0xff]  ;;  %v194_v59 = vld [vmem:[%s535_s2] sm:$0xff]  ;;  %v196_v6 = vld [vmem:[%s535_s2 + $0x10] sm:$0xff] }
   0xb   :  { %v132_v19 = vunpack.c.l.b16 %v55_v11  ;;  %v60_v20 = vpack.c.b16 %v59_v13, %v58_v12  ;;  %v83_v26 = vunpack.c.l.b16 %v50_v21  ;;  %v36_v34 = vpack.c.bf16 %v32_v30, %v32_v30  ;;  %v195_v7 = vld [vmem:[%s535_s2 + $0x8] sm:$0xff] }
   0xc   :  { %v109_v23 = vpack.c.b16 %v108_v17, %v107_v14  ;;  %v84_v27 = vunpack.c.l.b16 %v51_v22  ;;  %v38_v36 = vpack.c.bf16 %v34_v31, %v34_v31  ;;  %v39_v37 = vpack.c.bf16 %v35_v32, %v35_v32 }
   0xd   :  { %v133_v24 = vpack.c.b16 %v132_v19, %v131_v18  ;;  %v66_v25 = vsel %vm61_vm0, %v60_v20, 0  ;;  %v37_v39 = vpack.c.bf16 %v33_v38, %v33_v38  ;;  %vm198_vm2 = vcmp.ge.f32.partialorder %v194_v59, 0.2  ;;  %v197_v19 = vld [vmem:[%s535_s2 + $0x18] sm:$0xff]  ;;  %s452_s2 = smov [#allocation5]  }
   0xe   :  { %75 = vmatpush.bf16.xpose.msra.mxu0 %v66_v25  ;;  %v114_v28 = vsel %vm61_vm0, %v109_v23, 0  ;;  %v85_v33 = vpack.c.b16 %v84_v27, %v83_v26  ;;  %vm200_vm3 = vcmp.ge.f32.partialorder %v196_v6, 0.2  ;;  %vm199_vm4 = vcmp.ge.f32.partialorder %v195_v7, 0.2  ;;  %s354_s6 = sshll.u32 %s452_s2, 4  ;;  %s355_s6 = int_to_ptr.vmem [resolvable:$true] %s354_s6 }
   0xf   :  { %v138_v29 = vsel %vm61_vm0, %v133_v24, 0  ;;  %123 = vmatpush.bf16.xpose.msra.mxu2 %v114_v28  ;;  %vm201_vm5 = vcmp.ge.f32.partialorder %v197_v19, 0.2 }
  0x10   :  { %147 = vmatpush.bf16.xpose.msra.mxu3 %v138_v29  ;;  %v90_v35 = vsel %vm61_vm0, %v85_v33, 0 }
  0x11   :  { %99 = vmatpush.bf16.xpose.msra.mxu1 %v90_v35 }
  0x15   :  { %369 = vmatmul.msk.bf16.vlgmr.msra.gmra.mxu0 %vm61_vm0, %v36_v34 }
  0x16   :  { %221 = vmatpush.bf16.msrb.mxu0 %v60_v20  ;;  %371 = vmatmul.msk.bf16.vlgmr.msra.gmra.mxu2 %vm61_vm0, %v38_v36 }
  0x17   :  { %255 = vmatpush.bf16.msrb.mxu2 %v109_v23  ;;  %372 = vmatmul.msk.bf16.vlgmr.msra.gmra.mxu3 %vm61_vm0, %v39_v37 }
  0x18   :  { %272 = vmatpush.bf16.msrb.mxu3 %v133_v24  ;;  %370 = vmatmul.msk.bf16.vlgmr.msra.gmra.mxu1 %vm61_vm0, %v37_v39 }
  0x19   :  { %238 = vmatpush.bf16.msrb.mxu1 %v85_v33 }
  0x92   :  { %v77_v40 = vpop.f32.mrf.mxu0 }
  0x93   :  { %v153_v41 = vmul.f32 0.6666667, %v77_v40 }
  0x95   :  { %v158_v42 = vsel %vm157_vm1, %v153_v41, -inf  ;;  %v101_v43 = vpop.f32.mrf.mxu1 }
  0x96   :  { %159 = vmax.xlane.f32.xlu1 %v158_v42  ;;  %v154_v44 = vmul.f32 0.6666667, %v101_v43 }
  0x98   :  { %v161_v49 = vsel %vm157_vm1, %v154_v44, -inf }
  0x99   :  { %v125_v45 = vpop.f32.mrf.mxu2 }
  0x9a   :  { %v149_v46 = vpop.f32.mrf.mxu3  ;;  %v155_v47 = vmul.f32 0.6666667, %v125_v45  ;;  %v79_v48 = vpop.f32.mrf.mxu0 }
  0x9b   :  { %v156_v51 = vmul.f32 0.6666667, %v149_v46 }
  0x9c   :  { %v164_v50 = vsel %vm157_vm1, %v155_v47, -inf }
  0x9d   :  { %165 = vmax.xlane.f32.xlu0 %v164_v50  ;;  %v103_v52 = vpop.f32.mrf.mxu1  ;;  %v167_v55 = vsel %vm157_vm1, %v156_v51, -inf }
  0x9e   :  { %162 = vmax.xlane.f32.xlu1 %v161_v49 }
  0xa1   :  { %v127_v53 = vpop.f32.mrf.mxu2 }
  0xa2   :  { %v151_v54 = vpop.f32.mrf.mxu3 }
  0xa5   :  { %168 = vmax.xlane.f32.xlu0 %v167_v55 }
 0x109   :  { %v160_v56 = vpop.xlane.xlu1 %159 }
 0x10a   :  { %v170_v57 = vsub.f32 %v153_v41, %v160_v56 }
 0x10c   :  { %v174_v58 = vmul.f32 1.442695, %v170_v57 }
 0x10e   :  { %381 = vpow2.f32 %v174_v58 }
 0x110   :  { %v166_v60 = vpop.xlane.xlu0 %165 }
 0x111   :  { %v172_v61 = vsub.f32 %v155_v47, %v166_v60  ;;  %v163_v62 = vpop.xlane.xlu1 %162 }
 0x112   :  { %v171_v63 = vsub.f32 %v154_v44, %v163_v62 }
 0x113   :  { %v178_v0 = vmul.f32 1.442695, %v172_v61 }
 0x114   :  { %v382_v1 = vpop.eup %381  ;;  %v176_v2 = vmul.f32 1.442695, %v171_v63 }
 0x115   :  { %383 = vpow2.f32 %v178_v0  ;;  %v182_v3 = vsel %vm157_vm1, %v382_v1, 0.0  ;;  %v202_v4 = vsel %vm198_vm2, %v382_v1, 0.0 }
 0x116   :  { %385 = vpow2.f32 %v176_v2  ;;  %183 = vadd.xlane.f32.xlu2 %v182_v3  ;;  %v206_v5 = vpack.c.bf16 %v202_v4, %v202_v4 }
 0x118   :  { %v169_v8 = vpop.xlane.xlu0 %168  ;;  %373 = vmatmul.msk.bf16.vlgmr.msrb.gmra.mxu0 %vm157_vm1, %v206_v5 }
 0x119   :  { %v173_v9 = vsub.f32 %v156_v51, %v169_v8 }
 0x11b   :  { %v384_v10 = vpop.eup %383  ;;  %v180_v11 = vmul.f32 1.442695, %v173_v9 }
 0x11c   :  { %v386_v12 = vpop.eup %385  ;;  %v188_v13 = vsel %vm157_vm1, %v384_v10, 0.0  ;;  %v204_v14 = vsel %vm200_vm3, %v384_v10, 0.0 }
 0x11d   :  { %387 = vpow2.f32 %v180_v11  ;;  %189 = vadd.xlane.f32.xlu0 %v188_v13  ;;  %v208_v15 = vpack.c.bf16 %v204_v14, %v204_v14  ;;  %v185_v16 = vsel %vm157_vm1, %v386_v12, 0.0  ;;  %v203_v17 = vsel %vm199_vm4, %v386_v12, 0.0 }
 0x11e   :  { %186 = vadd.xlane.f32.xlu2 %v185_v16  ;;  %v207_v18 = vpack.c.bf16 %v203_v17, %v203_v17 }
 0x11f   :  { %375 = vmatmul.msk.bf16.vlgmr.msrb.gmra.mxu2 %vm157_vm1, %v208_v15 }
 0x120   :  { %374 = vmatmul.msk.bf16.vlgmr.msrb.gmra.mxu1 %vm157_vm1, %v207_v18 }
 0x123   :  { %v388_v20 = vpop.eup %387 }
 0x124   :  { %v191_v21 = vsel %vm157_vm1, %v388_v20, 0.0  ;;  %v205_v22 = vsel %vm201_vm5, %v388_v20, 0.0 }
 0x125   :  { %192 = vadd.xlane.f32.xlu1 %v191_v21  ;;  %v209_v23 = vpack.c.bf16 %v205_v22, %v205_v22 }
 0x127   :  { %376 = vmatmul.msk.bf16.vlgmr.msrb.gmra.mxu3 %vm157_vm1, %v209_v23 }
 0x189   :  { %v184_v24 = vpop.xlane.xlu2 %183 }
 0x18a   :  { %v278_v25 = vmul.f32 0.8, %v184_v24 }
 0x18c   :  { %389 = vrcp.f32 %v278_v25  ;;  %v293_v34 = vand.u32 2147483648, %v278_v25  ;;  %v291_v36 = vand.u32 2147483647, %v278_v25  ;;  %vm287_vm7 = vweird.f32 %v278_v25 }
 0x18e   :  { %v294_v43 = vor.u32 1.1754944e-38, %v293_v34  ;;  %vm292_vm9 = vcmp.eq.f32.partialorder %v291_v36, 8.507059e+37 }
 0x190   :  { %v190_v26 = vpop.xlane.xlu0 %189 }
 0x191   :  { %v280_v27 = vmul.f32 0.8, %v190_v26  ;;  %v187_v28 = vpop.xlane.xlu2 %186 }
 0x192   :  { %v390_v29 = vpop.eup %389  ;;  %v279_v30 = vmul.f32 0.8, %v187_v28 }
 0x193   :  { %391 = vrcp.f32 %v280_v27  ;;  %v283_v31 = vmul.f32 %v390_v29, %v278_v25  ;;  %vm288_vm6 = vweird.f32 %v390_v29  ;;  %v323_v52 = vand.u32 2147483648, %v280_v27 }
 0x194   :  { %393 = vrcp.f32 %v279_v30  ;;  %vm289_vm8 = vmor %vm287_vm7, %vm288_vm6  ;;  %v308_v53 = vand.u32 2147483648, %v279_v30  ;;  %v321_v55 = vand.u32 2147483647, %v280_v27  ;;  %v306_v57 = vand.u32 2147483647, %v279_v30 }
 0x195   :  { %v223_v32 = vpop.f32.mrf.mxu0  ;;  %v284_v33 = vsub.f32 1.0, %v283_v31  ;;  %vm317_vm12 = vweird.f32 %v280_v27  ;;  %vm302_vm13 = vweird.f32 %v279_v30  ;;  %v324_v61 = vor.u32 1.1754944e-38, %v323_v52 }
 0x196   :  { %v309_v63 = vor.u32 1.1754944e-38, %v308_v53  ;;  %vm322_vm1 = vcmp.eq.f32.partialorder %v321_v55, 8.507059e+37  ;;  %vm307_vm2 = vcmp.eq.f32.partialorder %v306_v57, 8.507059e+37 }
 0x197   :  { %v285_v35 = vmul.f32 %v390_v29, %v284_v33 }
 0x198   :  { %v193_v37 = vpop.xlane.xlu1 %192 }
 0x199   :  { %v392_v38 = vpop.eup %391  ;;  %v286_v39 = vadd.f32 %v390_v29, %v285_v35  ;;  %v281_v40 = vmul.f32 0.8, %v193_v37 }
 0x19a   :  { %v394_v41 = vpop.eup %393  ;;  %v313_v42 = vmul.f32 %v392_v38, %v280_v27  ;;  %vm318_vm10 = vweird.f32 %v392_v38 }
 0x19b   :  { %v298_v44 = vmul.f32 %v394_v41, %v279_v30  ;;  %v290_v45 = vsel %vm289_vm8, %v390_v29, %v286_v39  ;;  %395 = vrcp.f32 %v281_v40  ;;  %vm303_vm11 = vweird.f32 %v394_v41  ;;  %vm319_vm14 = vmor %vm317_vm12, %vm318_vm10 }
 0x19c   :  { %v295_v46 = vsel %vm292_vm9, %v294_v43, %v290_v45  ;;  %v314_v47 = vsub.f32 1.0, %v313_v42  ;;  %vm304_vm15 = vmor %vm302_vm13, %vm303_vm11  ;;  %v338_v9 = vand.u32 2147483648, %v281_v40  ;;  %v336_v11 = vand.u32 2147483647, %v281_v40 }
 0x19d   :  { %v342_v48 = vmul.f32 %v295_v46, %v223_v32  ;;  %v225_v49 = vpop.f32.mrf.mxu0  ;;  %v240_v50 = vpop.f32.mrf.mxu1  ;;  %v299_v51 = vsub.f32 1.0, %v298_v44  ;;  %vm332_vm4 = vweird.f32 %v281_v40 }
 0x19e   :  { %v315_v54 = vmul.f32 %v392_v38, %v314_v47  ;;  %v339_v13 = vor.u32 1.1754944e-38, %v338_v9  ;;  %vm337_vm6 = vcmp.eq.f32.partialorder %v336_v11, 8.507059e+37 }
 0x19f   :  { %346 = vst.msk [vmem:[#allocation5] sm:$0xff] %vm61_vm0, %v342_v48  ;;  %v300_v56 = vmul.f32 %v394_v41, %v299_v51 }
 0x1a0   :  { %v316_v58 = vadd.f32 %v392_v38, %v315_v54 }
 0x1a1   :  { %v396_v59 = vpop.eup %395  ;;  %v301_v60 = vadd.f32 %v394_v41, %v300_v56 }
 0x1a2   :  { %v328_v62 = vmul.f32 %v396_v59, %v281_v40  ;;  %v257_v0 = vpop.f32.mrf.mxu2  ;;  %v320_v1 = vsel %vm319_vm14, %v392_v38, %v316_v58  ;;  %vm333_vm3 = vweird.f32 %v396_v59 }
 0x1a3   :  { %v305_v2 = vsel %vm304_vm15, %v394_v41, %v301_v60  ;;  %v325_v3 = vsel %vm322_vm1, %v324_v61, %v320_v1  ;;  %vm334_vm5 = vmor %vm332_vm4, %vm333_vm3 }
 0x1a4   :  { %v310_v4 = vsel %vm307_vm2, %v309_v63, %v305_v2  ;;  %v344_v5 = vmul.f32 %v325_v3, %v257_v0  ;;  %v329_v6 = vsub.f32 1.0, %v328_v62 }
 0x1a5   :  { %v343_v7 = vmul.f32 %v310_v4, %v240_v50  ;;  %v242_v8 = vpop.f32.mrf.mxu1 }
 0x1a6   :  { %348 = vst.msk [vmem:[#allocation5 + $0x10] sm:$0xff] %vm61_vm0, %v344_v5  ;;  %v330_v10 = vmul.f32 %v396_v59, %v329_v6 }
 0x1a7   :  { %347 = vst.msk [vmem:[#allocation5 + $0x8] sm:$0xff] %vm61_vm0, %v343_v7 }
 0x1a8   :  { %v331_v12 = vadd.f32 %v396_v59, %v330_v10 }
 0x1aa   :  { %v259_v14 = vpop.f32.mrf.mxu2  ;;  %v274_v15 = vpop.f32.mrf.mxu3  ;;  %v335_v16 = vsel %vm334_vm5, %v396_v59, %v331_v12 }
 0x1ab   :  { %v340_v17 = vsel %vm337_vm6, %v339_v13, %v335_v16 }
 0x1ac   :  { %v345_v18 = vmul.f32 %v340_v17, %v274_v15 }
 0x1ae   :  { %349 = vst.msk [vmem:[#allocation5 + $0x18] sm:$0xff] %vm61_vm0, %v345_v18 }
 0x1af   :  { %362 = dma.vmem_to_hbm [thread:$0]  %s355_s6, 512, %s357_s9, [#allocation4], %s450_s17, %s450_s17, %s451_s18  }
 0x1b2   :  { %v276_v19 = vpop.f32.mrf.mxu3 }
 0x1b3   :  { %447 = dma.done.wait [#allocation4], 512  }
 0x1b4   :  { %448 = vsyncadd [#allocation4], 4294966784 }
 0x1b5   :  { %367 = vsyncpa [#allocation3], 1 }
 0x1b6   :  { %368 = vsyncpa [#allocation4], 1 }

</bundles_post_ra>
